<compile_context>
chip_gen: v7x
topology: tpu7x:2x2x1
jax: 0.10.0
libtpu: 0.0.40
codegen_flags: <defaults>
</compile_context>

<pallas_src>
import functools

import jax
import jax.numpy as jnp
from jax.experimental import pallas as pl
from jax.experimental.pallas import tpu as pltpu

LRELU_SLOPE = 0.1
_LANE = 128


# --------------------------------------------------------------- TPU kernel
def _uniform_from_bits(shape):
    """Uniform [0, 1) float32 from the on-chip PRNG (== torch.rand_like)."""
    bits = pltpu.prng_random_bits(shape)
    if bits.dtype != jnp.uint32:
        bits = pltpu.bitcast(bits, jnp.uint32)
    # 23 random mantissa bits -> float in [1, 2), then subtract 1.
    f = pltpu.bitcast((bits >> jnp.uint32(9)) | jnp.uint32(0x3F800000), jnp.float32)
    return f - 1.0


def _gn_tpu_kernel(seed_ref, w_ref, x_ref, o_ref, *, slope):
    # Independent, deterministic random stream per grid tile.
    pltpu.prng_seed(seed_ref[0], pl.program_id(0))
    x = x_ref[...]
    noise = _uniform_from_bits(x.shape) * w_ref[0]          # f32, scaled by w
    if x.dtype != jnp.float32:
        noise = noise.astype(x.dtype)                       # bf16: add in bf16
    y = x + noise
    o_ref[...] = jnp.maximum(y, slope * y).astype(o_ref.dtype)   # leaky ReLU


# ------------------------------------------------- portable fallback kernel
def _gn_fallback_kernel(x_ref, sn_ref, o_ref, *, slope):
    y = x_ref[...] + sn_ref[...]
    o_ref[...] = jnp.maximum(y, slope * y).astype(o_ref.dtype)


# ------------------------------------------------------------------ wrapper
def gaussian_noise_pallas(x, w, seed, *, slope=LRELU_SLOPE, max_block_rows=4096):
    """x: activation of any shape (e.g. (B, C, T)); w: scalar param; seed: int."""
    orig_shape = x.shape
    n = x.size
    itemsize = jnp.dtype(x.dtype).itemsize

    # ---- lane-dense (rows, 128) view of x (free reshape when 128-divisible) --
    pad = (-n) % _LANE
    if pad:
        # TODO(synk): sizes with numel % 128 != 0 pay one pad copy + one slice
        # copy; generator activations are normally 128-divisible so this path
        # is rarely taken.
        x_flat = jnp.pad(x.reshape(-1), (0, pad))
    else:
        x_flat = x.reshape(-1)
    rows = (n + pad) // _LANE
    x2 = x_flat.reshape(rows, _LANE)

    # ---- tiling: big sublane-aligned blocks; ragged tail masked by Pallas ----
    # max_block_rows % 32 == 0 keeps the block sublane-tile aligned for
    # f32 (8), bf16 (16) and int8/fp8 (32) packing.
    assert max_block_rows % 32 == 0
    row_block = rows if rows <= max_block_rows else max_block_rows
    grid = (pl.cdiv(rows, row_block),)

    w_arr = jnp.asarray(w, jnp.float32).reshape(1)

    if jax.default_backend() == "tpu":
        seed_arr = jnp.asarray([seed], jnp.int32)
        kernel = functools.partial(_gn_tpu_kernel, slope=slope)
        out2 = pl.pallas_call(
            kernel,
            out_shape=jax.ShapeDtypeStruct((rows, _LANE), x.dtype),
            grid_spec=pltpu.PrefetchScalarGridSpec(
                num_scalar_prefetch=2,                      # seed, w -> SMEM
                grid=grid,
                in_specs=[pl.BlockSpec((row_block, _LANE),
                                       lambda i, seed, w: (i, 0))],
                out_specs=pl.BlockSpec((row_block, _LANE),
                                       lambda i, seed, w: (i, 0)),
            ),
            compiler_params=pltpu.CompilerParams(
                dimension_semantics=("parallel",)),
            cost_estimate=pl.CostEstimate(flops=5 * n, transcendentals=0,
                                          bytes_accessed=2 * n * itemsize),
        )(seed_arr, w_arr, x2)
    else:
        # Non-TPU backends (CPU / interpret sandbox): the TPU hardware PRNG has
        # no lowering here, so draw the uniform noise with jax.random and fuse
        # only add + leaky-ReLU in the kernel.
        noise = jax.random.uniform(jax.random.PRNGKey(seed), (rows, _LANE),
                                   jnp.float32)
        sn = (noise * w_arr[0]).astype(x.dtype)
        kernel = functools.partial(_gn_fallback_kernel, slope=slope)
        out2 = pl.pallas_call(
            kernel,
            out_shape=jax.ShapeDtypeStruct((rows, _LANE), x.dtype),
            grid=grid,
            in_specs=[pl.BlockSpec((row_block, _LANE), lambda i: (i, 0)),
                      pl.BlockSpec((row_block, _LANE), lambda i: (i, 0))],
            out_specs=pl.BlockSpec((row_block, _LANE), lambda i: (i, 0)),
        )(x2, sn)

    if pad:
        return out2.reshape(-1)[:n].reshape(orig_shape)
    return out2.reshape(orig_shape)                         # free reshape


if __name__ == "__main__":
    key = jax.random.PRNGKey(0)
    B, C, T = 2, 4, 16
    x = jax.random.normal(key, (B, C, T), jnp.float32)

    def leaky(v, s=LRELU_SLOPE):
        return jnp.where(v >= 0, v, s * v)

    # --- w = 1e-6 (module's init value): out ~= leaky_relu(x), and since the
    #     noise is in [0,1): leaky(x) <= out <= leaky(x + w). ---
    w_small = jnp.float32(1e-6)
    out = jax.block_until_ready(gaussian_noise_pallas(x, w_small, seed=0))
    assert out.shape == x.shape and out.dtype == x.dtype
    lo, hi = leaky(x), leaky(x + w_small)
    assert bool(jnp.all(out >= lo - 1e-7)), "output below leaky_relu(x)"
    assert bool(jnp.all(out <= hi + 1e-7)), "output above leaky_relu(x + w)"
    assert jnp.allclose(out, lo, atol=2e-6), "w=1e-6 output should ~= leaky_relu(x)"

    # --- determinism for a fixed seed ---
    out_again = jax.block_until_ready(gaussian_noise_pallas(x, w_small, seed=0))
    assert bool(jnp.all(out == out_again)), "same seed must be deterministic"

    # --- larger w: invert leaky ReLU, recover the noise, check uniform [0,1) ---
    w_big = jnp.float32(0.5)
    out3 = jax.block_until_ready(gaussian_noise_pallas(x, w_big, seed=123))
    z = jnp.where(out3 >= 0, out3, out3 / LRELU_SLOPE)       # invert leaky ReLU
    n_rec = (z - x) / w_big
    assert bool(jnp.all(n_rec >= -1e-4)), "recovered noise below 0"
    assert bool(jnp.all(n_rec <= 1.0 + 1e-4)), "recovered noise above 1"
    m = float(jnp.mean(n_rec))
    assert 0.2 < m < 0.8, f"recovered noise mean {m} not uniform-like"

    # --- different seeds -> different noise ---
    out4 = jax.block_until_ready(gaussian_noise_pallas(x, w_big, seed=456))
    assert not bool(jnp.all(out3 == out4)), "different seeds should differ"

    # TODO(synk): cannot reproduce torch.rand_like's exact RNG stream; noise is
    # distribution-equivalent (uniform [0,1)).
    print("KERNEL_OK")
</pallas_src>

<mosaic_0001>
module attributes {stable_mosaic.version = 11 : i64} {
  func.func @_gn_fallback_kernel(%arg0: i32, %arg1: memref<1x128xf32, #tpu.memory_space<vmem>>, %arg2: memref<1x128xf32, #tpu.memory_space<vmem>>, %arg3: memref<1x128xf32, #tpu.memory_space<vmem>>) attributes {dimension_semantics = [#tpu.dimension_semantics<arbitrary>], iteration_bounds = array<i64: 1>, scalar_prefetch = 0 : i64, scratch_operands = 0 : i64, tpu.core_type = #tpu.core_type<tc>, window_params = [{transform_indices = @transform_0, window_bounds = array<i64: 1, 128>}, {transform_indices = @transform_1, window_bounds = array<i64: 1, 128>}, {transform_indices = @transform_2, window_bounds = array<i64: 1, 128>}]} {
    %c0 = arith.constant 0 : index
    %c0_0 = arith.constant 0 : index
    %0 = vector.load %arg1[%c0, %c0_0] : memref<1x128xf32, #tpu.memory_space<vmem>>, vector<1x128xf32>
    %c0_1 = arith.constant 0 : index
    %c0_2 = arith.constant 0 : index
    %1 = vector.load %arg2[%c0_1, %c0_2] : memref<1x128xf32, #tpu.memory_space<vmem>>, vector<1x128xf32>
    %2 = arith.addf %0, %1 : vector<1x128xf32>
    %cst = arith.constant 1.000000e-01 : f32
    %3 = vector.broadcast %cst : f32 to vector<1x128xf32>
    %4 = arith.mulf %3, %2 : vector<1x128xf32>
    %5 = arith.maximumf %2, %4 : vector<1x128xf32>
    %c0_3 = arith.constant 0 : index
    %c0_4 = arith.constant 0 : index
    %6 = vector.load %arg3[%c0_3, %c0_4] : memref<1x128xf32, #tpu.memory_space<vmem>>, vector<1x128xf32>
    tpu.vector_store %arg3[%c0_3, %c0_4], %5 {strides = array<i32>} : memref<1x128xf32, #tpu.memory_space<vmem>>, vector<1x128xf32>,
    return
  }
  func.func @transform_0(%arg0: i32) -> (i32, i32) {
    %c0_i32 = arith.constant 0 : i32
    %c0_i32_0 = arith.constant 0 : i32
    return %arg0, %c0_i32 : i32, i32
  }
  func.func @transform_1(%arg0: i32) -> (i32, i32) {
    %c0_i32 = arith.constant 0 : i32
    %c0_i32_0 = arith.constant 0 : i32
    return %arg0, %c0_i32 : i32, i32
  }
  func.func @transform_2(%arg0: i32) -> (i32, i32) {
    %c0_i32 = arith.constant 0 : i32
    %c0_i32_0 = arith.constant 0 : i32
    return %arg0, %c0_i32 : i32, i32
  }
}

</mosaic_0001>

<bundles_post_ra>
// kernel: tpu_custom_call.1
= control target key start
LH: loop header
LB: loop body
LE: loop exit
PB: predicated region body
PF: predicated region fallthrough
CT: control target
= control target key end

     0   :  { %7 = vsyncpa [#allocation3], 0  ;;  %s139_s0 = inlined_call_operand.hbm [shape: f32[1,128], index: 0, kind: input, shape index: {}]   ;;  %s140_s1 = inlined_call_operand.vmem [shape: f32[1,128], index: 1, kind: input, shape index: {}]   ;;  %s141_s2 = inlined_call_operand.hbm [shape: f32[1,128], index: 2, kind: output, shape index: {}]  }
   0x1   :  { %8 = vsyncpa [#allocation4], 0  ;;  %s95_s9 = smov [#allocation2]   ;;  %s47_s13 = scalar_lea.hbm %s139_s0, 16 }
   0x2   :  { %s15_s10 = sshll.u32 %s95_s9, 4  ;;  %p48_p0 = scmp.ne.s32.totalorder %s139_s0, %s47_s13  ;;  %s16_s10 = int_to_ptr.vmem [resolvable:$true] %s15_s10 }
   0x3   :  { %p51_p1 = scmp.lt.u32.totalorder %s47_s13, %s139_s0 }
   0x5   :  { %p53_p2 = pnand %p51_p1, %p48_p0 }
   0x7   :  { %56 = shalt.err (!%p53_p2)
}
   0x8   :  { %s57_s18 = scalar_lea.vmem %s16_s10, 16  ;;  %s61_s19 = scalar_lea.vmem %s16_s10, 32 }
   0x9   :  { %p58_p3 = scmp.ne.s32.totalorder %s16_s10, %s57_s18  ;;  %p62_p4 = scmp.lt.s32.totalorder %s16_s10, %s16_s10 }
   0xa   :  { %p63_p5 = scmp.lt.s32.totalorder %s61_s19, %s57_s18 }
   0xc   :  { %p64_p6 = por %p63_p5, %p62_p4 }
   0xe   :  { %p65_p7 = pnand %p64_p6, %p58_p3 }
  0x10   :  { %68 = shalt.err (!%p65_p7)
}
  0x11   :  { %18 = dma.hbm_to_vmem [thread:$0]  %s139_s0, 16, %s16_s10, [#allocation3]  }
  0x12   :  { %91 = dma.done.wait [#allocation3], 16  }
  0x13   :  { %92 = vsyncadd [#allocation3], 4294967280  ;;  %v24_v0 = vld [vmem:[#allocation2] sm:$0x1]  ;;  %s96_s24 = smov [#allocation5]  }
  0x14   :  { %v25_v1 = vld [vmem:[%s140_s1] sm:$0x1]  ;;  %s36_s25 = sshll.u32 %s96_s24, 4  ;;  %s37_s25 = int_to_ptr.vmem [resolvable:$true] %s36_s25 }
  0x15   :  { %v26_v2 = vadd.f32 %v25_v1, %v24_v0  ;;  %s69_s26 = scalar_lea.vmem %s37_s25, 16  ;;  %s73_s27 = scalar_lea.vmem %s37_s25, 32 }
  0x16   :  { %p70_p8 = scmp.ne.s32.totalorder %s37_s25, %s69_s26  ;;  %p74_p9 = scmp.lt.s32.totalorder %s37_s25, %s37_s25 }
  0x17   :  { %v27_v3 = vmul.f32 0.1, %v26_v2  ;;  %p75_p10 = scmp.lt.s32.totalorder %s73_s27, %s69_s26 }
  0x19   :  { %v28_v4 = vmax.f32 %v26_v2, %v27_v3  ;;  %p76_p11 = por %p75_p10, %p74_p9 }
  0x1b   :  { %29 = vst [vmem:[#allocation5] sm:$0x1] %v28_v4  ;;  %p77_p12 = pnand %p76_p11, %p70_p8 }
  0x1d   :  { %80 = shalt.err (!%p77_p12)
}
  0x1e   :  { %s81_s29 = scalar_lea.hbm %s141_s2, 16 }
  0x1f   :  { %p82_p13 = scmp.ne.s32.totalorder %s141_s2, %s81_s29  ;;  %p85_p0 = scmp.lt.u32.totalorder %s81_s29, %s141_s2 }
  0x21   :  { %p87_p1 = pnand %p85_p0, %p82_p13 }
  0x23   :  { %90 = shalt.err (!%p87_p1)
}
  0x24   :  { %39 = dma.vmem_to_hbm [thread:$0]  %s37_s25, 16, %s141_s2, [#allocation4]  }
  0x25   :  { %93 = dma.done.wait [#allocation4], 16  }
  0x26   :  { %94 = vsyncadd [#allocation4], 4294967280 }
  0x27   :  { %43 = vsyncpa [#allocation3], 1 }
  0x28   :  { %44 = vsyncpa [#allocation4], 1 }

</bundles_post_ra>
